<compile_context>
chip_gen: v6e
topology: v6e:2x2x1
jax: 0.10.0
libtpu: 0.0.40
codegen_flags: <defaults>
</compile_context>

<pallas_src>
import functools
import numpy as np
import jax
import jax.numpy as jnp
from jax import lax
from jax.experimental import pallas as pl
from jax.experimental.pallas import tpu as pltpu


MATMUL_DTYPE = jnp.bfloat16       # MXU operand dtype (accumulation is always f32)
_BN_EPS = 1e-5
_SQRT_2_OVER_PI = 0.7978845608028654


def _round_up(x, m):
    return (x + m - 1) // m * m


def _gelu_tanh(x):
    # TODO(synk): PyTorch nn.GELU() defaults to the exact erf form; erf has no
    # guaranteed Mosaic lowering, so the tanh approximation is used (~1e-3 max abs err).
    return 0.5 * x * (1.0 + jnp.tanh(_SQRT_2_OVER_PI * (x + 0.044715 * x * x * x)))


# ------------------------------ Pallas kernel --------------------------------

def _matmul_bias_act_kernel(x_ref, w_ref, b_ref, o_ref, *, apply_gelu):
    # Fused conv-as-GEMM tile: (TM, K) @ (K, Co) on the MXU with f32 accumulation,
    # + folded-BatchNorm bias, + optional GELU epilogue (VPU/EUP work hides under MXU).
    acc = jnp.dot(x_ref[...], w_ref[...], preferred_element_type=jnp.float32)
    y = acc + b_ref[...]
    if apply_gelu:
        y = _gelu_tanh(y)
    o_ref[...] = y.astype(o_ref.dtype)


def _choose_row_tile(M, tm_max=1024):
    """Row tile: multiple of 16 (bf16 sublane pack), capped at tm_max, and >=2 grid
    steps whenever M > 16 so the 'parallel' axis splits across both v7x TensorCores."""
    m16 = _round_up(M, 16)
    steps = 1 if m16 <= 16 else max(2, pl.cdiv(m16, tm_max))
    tm = _round_up(pl.cdiv(m16, steps), 16)
    return tm, steps * tm


def _matmul_bias_act(x2d, w, b, *, apply_gelu, out_dtype, tm_max=1024):
    """y = x2d @ w + b (+GELU).  x2d:(M,K) bf16  w:(K,Co) bf16  b:(Co,) f32."""
    M, K = x2d.shape
    Co = w.shape[1]
    tm, Mp = _choose_row_tile(M, tm_max)
    if Mp != M:
        x2d = jnp.pad(x2d, ((0, Mp - M), (0, 0)))

    cost = pl.CostEstimate(
        flops=2 * Mp * K * Co,
        transcendentals=Mp * Co if apply_gelu else 0,
        bytes_accessed=(Mp * K + K * Co) * 2 + Co * 4
                       + Mp * Co * jnp.dtype(out_dtype).itemsize)

    out = pl.pallas_call(
        functools.partial(_matmul_bias_act_kernel, apply_gelu=apply_gelu),
        out_shape=jax.ShapeDtypeStruct((Mp, Co), out_dtype),
        grid=(Mp // tm,),
        in_specs=[
            pl.BlockSpec((tm, K), lambda i: (i, 0)),      # activation row tile
            pl.BlockSpec((K, Co), lambda i: (0, 0)),      # weights stay resident
            pl.BlockSpec((1, Co), lambda i: (0, 0)),      # folded-BN bias (f32)
        ],
        out_specs=pl.BlockSpec((tm, Co), lambda i: (i, 0)),
        compiler_params=pltpu.CompilerParams(
            dimension_semantics=("parallel",)),
        cost_estimate=cost,
    )(x2d.astype(MATMUL_DTYPE), w.astype(MATMUL_DTYPE),
      b.reshape(1, Co).astype(jnp.float32))
    return out[:M]


# --------------------------- XLA-side data/weight prep ------------------------

def _im2col_3x3_s2(x_nhwc):
    """Patch extraction for a 3x3 / stride-2 / pad-1 conv (conv-as-GEMM layout).

    Input should already be MATMUL_DTYPE so the materialized cols array is bf16.
    Returns (cols, Ho, Wo): cols has shape (N*Ho*Wo, 9*C), rows ordered (n, ho, wo);
    tap channel blocks are ordered (kh, kw) to match w.reshape(9*C, Cout).
    """
    N, H, W, C = x_nhwc.shape
    Ho, Wo = (H + 1) // 2, (W + 1) // 2
    xp = jnp.pad(x_nhwc, ((0, 0), (1, 1), (1, 1), (0, 0)))
    taps = [xp[:, kh:kh + 2 * Ho:2, kw:kw + 2 * Wo:2, :]
            for kh in range(3) for kw in range(3)]
    cols = jnp.concatenate(taps, axis=-1)                    # (N, Ho, Wo, 9C)
    return cols.reshape(N * Ho * Wo, 9 * C), Ho, Wo


def _fold_bn(w_hwio, b, gamma, beta, mean, var):
    """Fold inference-mode BatchNorm into the preceding conv's weights / bias."""
    s = gamma / jnp.sqrt(var + _BN_EPS)
    return w_hwio * s, (b - mean) * s + beta


def prepare_stem_params(p):
    """One-time prep: fold BN into the convs, reshape for GEMM, pre-cast to bf16
    (biases stay f32 for the epilogue)."""
    w1, b1 = _fold_bn(p['conv1_w'], p['conv1_b'], p['bn1_gamma'], p['bn1_beta'],
                      p['bn1_mean'], p['bn1_var'])
    w2, b2 = _fold_bn(p['conv2_w'], p['conv2_b'], p['bn2_gamma'], p['bn2_beta'],
                      p['bn2_mean'], p['bn2_var'])
    c_mid, c_out = w1.shape[-1], w2.shape[-1]
    return {
        'w1': w1.reshape(-1, c_mid).astype(MATMUL_DTYPE),
        'b1': b1.astype(jnp.float32),
        'w2': w2.reshape(-1, c_out).astype(MATMUL_DTYPE),
        'b2': b2.astype(jnp.float32),
    }


# ---------------------------------- forward ----------------------------------

@jax.jit
def stem_conv_forward(x_nchw, fp):
    """StemConv: conv3x3/s2 + BN + GELU + conv3x3/s2 + BN, then flatten(2).transpose(1,2).

    `fp` is the output of prepare_stem_params.
    Returns (tokens, H, W) with tokens of shape (N, H*W, out_channels) in f32.
    """
    # NHWC with channels on lanes; cast to bf16 up front so im2col materializes bf16.
    x = jnp.transpose(x_nchw, (0, 2, 3, 1)).astype(MATMUL_DTYPE)
    N = x.shape[0]

    # Stage 1: conv + BN + GELU fused into one Pallas GEMM; bf16 output feeds stage 2.
    cols1, Ho1, Wo1 = _im2col_3x3_s2(x)
    c_mid = fp['w1'].shape[1]
    y1 = _matmul_bias_act(cols1, fp['w1'], fp['b1'],
                          apply_gelu=True, out_dtype=MATMUL_DTYPE)
    y1 = y1.reshape(N, Ho1, Wo1, c_mid)

    # Stage 2: conv + BN fused into one Pallas GEMM; final tokens emitted in f32.
    cols2, Ho2, Wo2 = _im2col_3x3_s2(y1)
    c_out = fp['w2'].shape[1]
    y2 = _matmul_bias_act(cols2, fp['w2'], fp['b2'],
                          apply_gelu=False, out_dtype=jnp.float32)

    # flatten(2).transpose(1,2) of the NCHW output == plain reshape of our NHWC layout.
    tokens = y2.reshape(N, Ho2 * Wo2, c_out)
    return tokens, Ho2, Wo2


# --------------------------- deterministic parameters -------------------------

def init_params(key, in_channels, out_channels):
    c_mid = out_channels // 2
    ks = jax.random.split(key, 12)
    nrm = lambda k, shape, s=0.1: jax.random.normal(k, shape, jnp.float32) * s
    uni = lambda k, shape, lo, hi: jax.random.uniform(k, shape, jnp.float32, lo, hi)
    return {
        'conv1_w': nrm(ks[0], (3, 3, in_channels, c_mid)),   # HWIO
        'conv1_b': nrm(ks[1], (c_mid,)),
        'bn1_gamma': uni(ks[2], (c_mid,), 0.8, 1.2),
        'bn1_beta': nrm(ks[3], (c_mid,)),
        'bn1_mean': nrm(ks[4], (c_mid,)),
        'bn1_var': uni(ks[5], (c_mid,), 0.5, 1.5),
        'conv2_w': nrm(ks[6], (3, 3, c_mid, out_channels)),
        'conv2_b': nrm(ks[7], (out_channels,)),
        'bn2_gamma': uni(ks[8], (out_channels,), 0.8, 1.2),
        'bn2_beta': nrm(ks[9], (out_channels,)),
        'bn2_mean': nrm(ks[10], (out_channels,)),
        'bn2_var': uni(ks[11], (out_channels,), 0.5, 1.5),
    }


# ------------------------ plain-JAX reference (for check) ---------------------

def reference_forward(x_nchw, p):
    x = jnp.transpose(x_nchw, (0, 2, 3, 1)).astype(jnp.float32)

    def conv_bn(h, w, b, g, bt, m, v, act):
        y = lax.conv_general_dilated(h, w, (2, 2), [(1, 1), (1, 1)],
                                     dimension_numbers=('NHWC', 'HWIO', 'NHWC'))
        y = y + b
        y = (y - m) / jnp.sqrt(v + _BN_EPS) * g + bt
        return _gelu_tanh(y) if act else y

    y = conv_bn(x, p['conv1_w'], p['conv1_b'], p['bn1_gamma'], p['bn1_beta'],
                p['bn1_mean'], p['bn1_var'], True)
    y = conv_bn(y, p['conv2_w'], p['conv2_b'], p['bn2_gamma'], p['bn2_beta'],
                p['bn2_mean'], p['bn2_var'], False)
    N, Ho, Wo, Co = y.shape
    return y.reshape(N, Ho * Wo, Co), Ho, Wo


# ------------------------------------ main ------------------------------------

if __name__ == "__main__":
    N, C_in, C_out, H, W = 2, 3, 32, 16, 16
    key = jax.random.PRNGKey(0)
    kx, kp = jax.random.split(key)
    x = jax.random.normal(kx, (N, C_in, H, W), jnp.float32)
    params = init_params(kp, C_in, C_out)
    folded = prepare_stem_params(params)

    tokens, h, w = stem_conv_forward(x, folded)
    tokens = jax.block_until_ready(tokens)

    ref_tokens, rh, rw = reference_forward(x, params)
    ref_tokens = jax.block_until_ready(ref_tokens)

    assert (int(h), int(w)) == (int(rh), int(rw))
    np.testing.assert_allclose(np.asarray(tokens), np.asarray(ref_tokens),
                               rtol=3e-2, atol=3e-2)
    print("KERNEL_OK")
</pallas_src>

<mosaic_0001>
module attributes {stable_mosaic.version = 11 : i64} {
  func.func @_matmul_bias_act_kernel(%arg0: i32, %arg1: memref<64x27xbf16, #tpu.memory_space<vmem>>, %arg2: memref<27x16xbf16, #tpu.memory_space<vmem>>, %arg3: memref<1x16xf32, #tpu.memory_space<vmem>>, %arg4: memref<64x16xbf16, #tpu.memory_space<vmem>>) attributes {dimension_semantics = [#tpu.dimension_semantics<parallel>], iteration_bounds = array<i64: 2>, scalar_prefetch = 0 : i64, scratch_operands = 0 : i64, tpu.core_type = #tpu.core_type<tc>, window_params = [{transform_indices = @transform_0, window_bounds = array<i64: 64, 27>}, {pipeline_mode = #tpu.pipeline_mode<synchronous>, transform_indices = @transform_1, window_bounds = array<i64: 27, 16>}, {pipeline_mode = #tpu.pipeline_mode<synchronous>, transform_indices = @transform_2, window_bounds = array<i64: 1, 16>}, {transform_indices = @transform_3, window_bounds = array<i64: 64, 16>}]} {
    %c0 = arith.constant 0 : index
    %c0_0 = arith.constant 0 : index
    %0 = vector.load %arg1[%c0, %c0_0] : memref<64x27xbf16, #tpu.memory_space<vmem>>, vector<64x27xbf16>
    %c0_1 = arith.constant 0 : index
    %c0_2 = arith.constant 0 : index
    %1 = vector.load %arg2[%c0_1, %c0_2] : memref<27x16xbf16, #tpu.memory_space<vmem>>, vector<27x16xbf16>
    %cst = arith.constant dense<0.000000e+00> : vector<64x16xf32>
    %2 = tpu.matmul %0, %1, %cst {dimension_numbers = #tpu.dot_dimension_numbers<[1], [0], [0], [1], [0, 0, 1, 1], [], []>} : vector<64x27xbf16>, vector<27x16xbf16>, vector<64x16xf32> -> vector<64x16xf32>
    %c0_3 = arith.constant 0 : index
    %c0_4 = arith.constant 0 : index
    %3 = vector.load %arg3[%c0_3, %c0_4] : memref<1x16xf32, #tpu.memory_space<vmem>>, vector<1x16xf32>
    %4 = vector.broadcast %3 : vector<1x16xf32> to vector<64x16xf32>
    %5 = arith.addf %2, %4 : vector<64x16xf32>
    %cst_5 = arith.constant 5.000000e-01 : f32
    %6 = vector.broadcast %cst_5 : f32 to vector<64x16xf32>
    %7 = arith.mulf %6, %5 : vector<64x16xf32>
    %cst_6 = arith.constant 4.471500e-02 : f32
    %8 = vector.broadcast %cst_6 : f32 to vector<64x16xf32>
    %9 = arith.mulf %8, %5 : vector<64x16xf32>
    %10 = arith.mulf %9, %5 : vector<64x16xf32>
    %11 = arith.mulf %10, %5 : vector<64x16xf32>
    %12 = arith.addf %5, %11 : vector<64x16xf32>
    %cst_7 = arith.constant 0.797884583 : f32
    %13 = vector.broadcast %cst_7 : f32 to vector<64x16xf32>
    %14 = arith.mulf %13, %12 : vector<64x16xf32>
    %15 = math.tanh %14 : vector<64x16xf32>
    %cst_8 = arith.constant 1.000000e+00 : f32
    %16 = vector.broadcast %cst_8 : f32 to vector<64x16xf32>
    %17 = arith.addf %16, %15 : vector<64x16xf32>
    %18 = arith.mulf %7, %17 : vector<64x16xf32>
    %19 = arith.truncf %18 : vector<64x16xf32> to vector<64x16xbf16>
    %c0_9 = arith.constant 0 : index
    %c0_10 = arith.constant 0 : index
    %20 = vector.load %arg4[%c0_9, %c0_10] : memref<64x16xbf16, #tpu.memory_space<vmem>>, vector<64x16xbf16>
    tpu.vector_store %arg4[%c0_9, %c0_10], %19 {strides = array<i32>} : memref<64x16xbf16, #tpu.memory_space<vmem>>, vector<64x16xbf16>,
    return
  }
  func.func @transform_0(%arg0: i32) -> (i32, i32) {
    %c0_i32 = arith.constant 0 : i32
    %c0_i32_0 = arith.constant 0 : i32
    return %arg0, %c0_i32 : i32, i32
  }
  func.func @transform_1(%arg0: i32) -> (i32, i32) {
    %c0_i32 = arith.constant 0 : i32
    %c0_i32_0 = arith.constant 0 : i32
    %c0_i32_1 = arith.constant 0 : i32
    return %c0_i32, %c0_i32_0 : i32, i32
  }
  func.func @transform_2(%arg0: i32) -> (i32, i32) {
    %c0_i32 = arith.constant 0 : i32
    %c0_i32_0 = arith.constant 0 : i32
    %c0_i32_1 = arith.constant 0 : i32
    return %c0_i32, %c0_i32_0 : i32, i32
  }
  func.func @transform_3(%arg0: i32) -> (i32, i32) {
    %c0_i32 = arith.constant 0 : i32
    %c0_i32_0 = arith.constant 0 : i32
    return %arg0, %c0_i32 : i32, i32
  }
}

module attributes {stable_mosaic.version = 11 : i64} {
  func.func @_matmul_bias_act_kernel(%arg0: i32, %arg1: memref<16x144xbf16, #tpu.memory_space<vmem>>, %arg2: memref<144x32xbf16, #tpu.memory_space<vmem>>, %arg3: memref<1x32xf32, #tpu.memory_space<vmem>>, %arg4: memref<16x32xf32, #tpu.memory_space<vmem>>) attributes {dimension_semantics = [#tpu.dimension_semantics<parallel>], iteration_bounds = array<i64: 2>, scalar_prefetch = 0 : i64, scratch_operands = 0 : i64, tpu.core_type = #tpu.core_type<tc>, window_params = [{transform_indices = @transform_0, window_bounds = array<i64: 16, 144>}, {pipeline_mode = #tpu.pipeline_mode<synchronous>, transform_indices = @transform_1, window_bounds = array<i64: 144, 32>}, {pipeline_mode = #tpu.pipeline_mode<synchronous>, transform_indices = @transform_2, window_bounds = array<i64: 1, 32>}, {transform_indices = @transform_3, window_bounds = array<i64: 16, 32>}]} {
    %c0 = arith.constant 0 : index
    %c0_0 = arith.constant 0 : index
    %0 = vector.load %arg1[%c0, %c0_0] : memref<16x144xbf16, #tpu.memory_space<vmem>>, vector<16x144xbf16>
    %c0_1 = arith.constant 0 : index
    %c0_2 = arith.constant 0 : index
    %1 = vector.load %arg2[%c0_1, %c0_2] : memref<144x32xbf16, #tpu.memory_space<vmem>>, vector<144x32xbf16>
    %cst = arith.constant dense<0.000000e+00> : vector<16x32xf32>
    %2 = tpu.matmul %0, %1, %cst {dimension_numbers = #tpu.dot_dimension_numbers<[1], [0], [0], [1], [0, 0, 1, 1], [], []>} : vector<16x144xbf16>, vector<144x32xbf16>, vector<16x32xf32> -> vector<16x32xf32>
    %c0_3 = arith.constant 0 : index
    %c0_4 = arith.constant 0 : index
    %3 = vector.load %arg3[%c0_3, %c0_4] : memref<1x32xf32, #tpu.memory_space<vmem>>, vector<1x32xf32>
    %4 = vector.broadcast %3 : vector<1x32xf32> to vector<16x32xf32>
    %5 = arith.addf %2, %4 : vector<16x32xf32>
    %c0_5 = arith.constant 0 : index
    %c0_6 = arith.constant 0 : index
    %6 = vector.load %arg4[%c0_5, %c0_6] : memref<16x32xf32, #tpu.memory_space<vmem>>, vector<16x32xf32>
    tpu.vector_store %arg4[%c0_5, %c0_6], %5 {strides = array<i32>} : memref<16x32xf32, #tpu.memory_space<vmem>>, vector<16x32xf32>,
    return
  }
  func.func @transform_0(%arg0: i32) -> (i32, i32) {
    %c0_i32 = arith.constant 0 : i32
    %c0_i32_0 = arith.constant 0 : i32
    return %arg0, %c0_i32 : i32, i32
  }
  func.func @transform_1(%arg0: i32) -> (i32, i32) {
    %c0_i32 = arith.constant 0 : i32
    %c0_i32_0 = arith.constant 0 : i32
    %c0_i32_1 = arith.constant 0 : i32
    return %c0_i32, %c0_i32_0 : i32, i32
  }
  func.func @transform_2(%arg0: i32) -> (i32, i32) {
    %c0_i32 = arith.constant 0 : i32
    %c0_i32_0 = arith.constant 0 : i32
    %c0_i32_1 = arith.constant 0 : i32
    return %c0_i32, %c0_i32_0 : i32, i32
  }
  func.func @transform_3(%arg0: i32) -> (i32, i32) {
    %c0_i32 = arith.constant 0 : i32
    %c0_i32_0 = arith.constant 0 : i32
    return %arg0, %c0_i32 : i32, i32
  }
}

</mosaic_0001>

<bundles_post_ra>
// kernel: stem_conv_forward.2
= control target key start
LH: loop header
LB: loop body
LE: loop exit
PB: predicated region body
PF: predicated region fallthrough
CT: control target
= control target key end

     0   :  { %s599_s12 = smov 0   ;;  %s706_s0 = inlined_call_operand.vmem [shape: bf16[128,27], index: 0, kind: input, shape index: {}]   ;;  %s707_s1 = inlined_call_operand.vmem [shape: bf16[27,16], index: 1, kind: input, shape index: {}]   ;;  %s708_s2 = inlined_call_operand.vmem [shape: f32[1,16], index: 2, kind: input, shape index: {}]   ;;  %s709_s3 = inlined_call_operand.vmem [shape: bf16[128,16], index: 3, kind: output, shape index: {}]  }
   0x1 LB: > { %s479_s13 = sadd.s32 4294967295, %s576_s12   ;;  %p483_p0 = scmp.ge.s32.totalorder %s576_s12, 1  ;;  %s576_s12 = sphi %s599_s12, %s13_s12  }
   0x2   : > { %p138_p1 = scmp.lt.s32.totalorder %s576_s12, 3 }
   0x4   : > { %p139_p2 = pnand %p483_p0, %p138_p1 }
   0x5   : > { %s484_s16 = sshll.u32 (!%p139_p2), %s479_s13, 3 }
   0x6   : > { %142 = sbr.rel (%p139_p2) target bundleno = 258 (0x102), region = 32  ;;  %p163_p3 = scmp.lt.s32.totalorder (!%p139_p2), %s484_s16, 15 }
   0xb   : > { %v548_v0 = vld [vmem:[%s707_s1 + $0x8] sm:$0x3f]   ;;  %vm238_vm0 = vcmask 1044480   ;;  %vm239_vm1 = vcmask 1045504   ;;  %v578_v1 = vmov 65535   ;;  %v549_v5 = vld [vmem:[%s707_s1] sm:$0xff]  }
   0xc   : > { %v240_v2 = vsel %vm238_vm0, 4294967295, %v578_v1  ;;  %s711_s16 = smov (!%p163_p3, %s484_s16), 15  ;;  %vm225_vm2 = vcmask 220160   ;;  %v488_v10 = vld [vmem:[%s708_s2] ss:$0 sm:$0xff]  ;;  %vm414_vm3 = vcmask 125952  }
   0xd   : > { %v241_v3 = vsel %vm239_vm1, %v240_v2, 0  ;;  %s485_s19 = sshll.u32 %s711_s16, 2 }
   0xe   : > { %v243_v4 = vand.u32 %v548_v0, %v241_v3  ;;  %s166_s22 = scalar_lea.vmem %s706_s0, %s485_s19  ;;  %s679_s27 = scalar_lea.vmem %s709_s3, %s485_s19 }
   0xf   : > { %v550_v6 = vld [vmem:[%s166_s22] sm:$0xff]   ;;  %v551_v7 = vld [vmem:[%s166_s22 + $0x10] sm:$0xff]   ;;  %v552_v8 = vld [vmem:[%s166_s22 + $0x8] sm:$0xff]  }
  0x10   : > { %523 = vmatprep.subr.bf16.mxu0 %v243_v4  ;;  %535 = vmatprep.subr.bf16.mxu1 %v243_v4  ;;  %v553_v9 = vld [vmem:[%s166_s22 + $0x18] sm:$0xff]  }
  0x11   : > { %524 = vmatpush3.bf16.msra.mxu0 %v243_v4  ;;  %537 = vmatpush3.bf16.msra.mxu1 %v243_v4 }
  0x12   : > { %525 = vmatprep.subr.bf16.mxu0 %v549_v5  ;;  %536 = vmatprep.subr.bf16.mxu1 %v549_v5 }
  0x13   : > { %527 = vmatprep.mubr.msk.bf16.mxu0 %vm225_vm2, %v550_v6  ;;  %531 = vmatprep.mubr.msk.bf16.mxu1 %vm225_vm2, %v551_v7 }
  0x15   : > { %526 = vmatpush3.bf16.msra.mxu0 %v549_v5  ;;  %538 = vmatpush3.bf16.msra.mxu1 %v549_v5 }
  0x18   : > { %528 = vmatmul.mubr.msk.bf16.vlgmr.msra.gmra.mxu0 %vm225_vm2, %v552_v8  ;;  %532 = vmatmul.mubr.msk.bf16.vlgmr.msra.gmra.mxu1 %vm225_vm2, %v553_v9 }
  0xd8   : > { %v529_v11 = vpop.f32.mrf.mxu0  ;;  %v533_v12 = vpop.f32.mrf.mxu1 }
  0xd9   : > { %v624_v13 = vadd.f32 %v529_v11, %v488_v10  ;;  %v626_v14 = vadd.f32 %v533_v12, %v488_v10 }
  0xda   : > { %v279_v15 = vpop.f32.mrf.mxu0  ;;  %v295_v16 = vpop.f32.mrf.mxu1 }
  0xdb   : > { %v320_v17 = vmul.f32 0.044715, %v624_v13  ;;  %v324_v18 = vmul.f32 0.044715, %v626_v14  ;;  %v630_v19 = vadd.f32 %v488_v10, %v279_v15  ;;  %v632_v20 = vadd.f32 %v488_v10, %v295_v16 }
  0xdc   : > { %v530_v21 = vpop.f32.mrf.mxu0  ;;  %v534_v22 = vpop.f32.mrf.mxu1  ;;  %v312_v5 = vmul.f32 0.5, %v624_v13  ;;  %v316_v7 = vmul.f32 0.5, %v626_v14 }
  0xdd   : > { %v328_v23 = vmul.f32 %v320_v17, %v624_v13  ;;  %v332_v24 = vmul.f32 %v324_v18, %v626_v14  ;;  %v636_v25 = vadd.f32 %v530_v21, %v488_v10  ;;  %v638_v26 = vadd.f32 %v534_v22, %v488_v10 }
  0xde   : > { %v318_v27 = vmul.f32 0.044715, %v630_v19  ;;  %v322_v28 = vmul.f32 0.044715, %v632_v20  ;;  %v282_v29 = vpop.f32.mrf.mxu0  ;;  %v298_v33 = vpop.f32.mrf.mxu1  ;;  %v310_v15 = vmul.f32 0.5, %v630_v19 }
  0xdf   : > { %v336_v30 = vmul.f32 %v328_v23, %v624_v13  ;;  %v340_v31 = vmul.f32 %v332_v24, %v626_v14  ;;  %v321_v32 = vmul.f32 0.044715, %v636_v25  ;;  %v325_v36 = vmul.f32 0.044715, %v638_v26 }
  0xe0   : > { %v326_v34 = vmul.f32 %v318_v27, %v630_v19  ;;  %v330_v35 = vmul.f32 %v322_v28, %v632_v20  ;;  %v651_v40 = vadd.f32 %v488_v10, %v282_v29  ;;  %v656_v44 = vadd.f32 %v488_v10, %v298_v33 }
  0xe1   : > { %v344_v37 = vadd.f32 %v336_v30, %v624_v13  ;;  %v348_v38 = vadd.f32 %v340_v31, %v626_v14  ;;  %v329_v39 = vmul.f32 %v321_v32, %v636_v25  ;;  %v333_v43 = vmul.f32 %v325_v36, %v638_v26 }
  0xe2   : > { %v334_v41 = vmul.f32 %v326_v34, %v630_v19  ;;  %v338_v42 = vmul.f32 %v330_v35, %v632_v20  ;;  %v319_v51 = vmul.f32 0.044715, %v651_v40  ;;  %v323_v53 = vmul.f32 0.044715, %v656_v44 }
  0xe3   : > { %v352_v45 = vmul.f32 0.7978846, %v344_v37  ;;  %v356_v46 = vmul.f32 0.7978846, %v348_v38  ;;  %v337_v47 = vmul.f32 %v329_v39, %v636_v25  ;;  %v341_v50 = vmul.f32 %v333_v43, %v638_v26 }
  0xe4   : > { %v342_v48 = vadd.f32 %v334_v41, %v630_v19  ;;  %v346_v49 = vadd.f32 %v338_v42, %v632_v20  ;;  %v327_v58 = vmul.f32 %v319_v51, %v651_v40  ;;  %v331_v59 = vmul.f32 %v323_v53, %v656_v44 }
  0xe5   : > { %554 = vtanh.f32 %v352_v45  ;;  %v345_v52 = vadd.f32 %v337_v47, %v636_v25  ;;  %v349_v56 = vadd.f32 %v341_v50, %v638_v26  ;;  %v314_v14 = vmul.f32 0.5, %v632_v20 }
  0xe6   : > { %556 = vtanh.f32 %v356_v46  ;;  %v350_v54 = vmul.f32 0.7978846, %v342_v48  ;;  %v354_v55 = vmul.f32 0.7978846, %v346_v49  ;;  %v335_v61 = vmul.f32 %v327_v58, %v651_v40 }
  0xe7   : > { %v353_v57 = vmul.f32 0.7978846, %v345_v52  ;;  %v357_v60 = vmul.f32 0.7978846, %v349_v56  ;;  %v339_v62 = vmul.f32 %v331_v59, %v656_v44  ;;  %v313_v24 = vmul.f32 0.5, %v636_v25 }
  0xe8   : > { %558 = vtanh.f32 %v350_v54  ;;  %v343_v63 = vadd.f32 %v335_v61, %v651_v40  ;;  %v317_v19 = vmul.f32 0.5, %v638_v26  ;;  %v311_v26 = vmul.f32 0.5, %v651_v40 }
  0xe9   : > { %560 = vtanh.f32 %v354_v55  ;;  %v347_v0 = vadd.f32 %v339_v62, %v656_v44  ;;  %v315_v37 = vmul.f32 0.5, %v656_v44 }
  0xea   : > { %562 = vtanh.f32 %v353_v57  ;;  %v351_v1 = vmul.f32 0.7978846, %v343_v63 }
  0xeb   : > { %564 = vtanh.f32 %v357_v60  ;;  %v355_v2 = vmul.f32 0.7978846, %v347_v0 }
  0xec   : > { %566 = vtanh.f32 %v351_v1 }
  0xed   : > { %568 = vtanh.f32 %v355_v2 }
  0xf2   : > { %v555_v3 = vpop.eup %554 }
  0xf3   : > { %v557_v4 = vpop.eup %556  ;;  %v368_v6 = vadd.f32 1.0, %v555_v3 }
  0xf4   : > { %v372_v8 = vadd.f32 1.0, %v557_v4 }
  0xf5   : > { %v559_v9 = vpop.eup %558  ;;  %v376_v10 = vmul.f32 %v368_v6, %v312_v5 }
  0xf6   : > { %v561_v11 = vpop.eup %560  ;;  %v380_v12 = vmul.f32 %v372_v8, %v316_v7  ;;  %v366_v13 = vadd.f32 1.0, %v559_v9 }
  0xf7   : > { %v563_v16 = vpop.eup %562  ;;  %v511_v17 = vpack.c.bf16 %v376_v10, %v376_v10  ;;  %v370_v18 = vadd.f32 1.0, %v561_v11 }
  0xf8   : > { %v565_v21 = vpop.eup %564  ;;  %v515_v22 = vpack.c.bf16 %v380_v12, %v380_v12  ;;  %v374_v23 = vmul.f32 %v366_v13, %v310_v15  ;;  %v369_v27 = vadd.f32 1.0, %v563_v16 }
  0xf9   : > { %417 = vst.msk [vmem:[%s679_s27 + $0x8] sm:$0xf] %vm414_vm3, %v511_v17  ;;  %v378_v28 = vmul.f32 %v370_v18, %v314_v14  ;;  %v373_v29 = vadd.f32 1.0, %v565_v21  ;;  %v567_v33 = vpop.eup %566 }
  0xfa   : > { %421 = vst.msk [vmem:[%s679_s27 + $0x18] sm:$0xf] %vm414_vm3, %v515_v22  ;;  %v509_v20 = vpack.c.bf16 %v374_v23, %v374_v23  ;;  %v377_v30 = vmul.f32 %v369_v27, %v313_v24  ;;  %v569_v34 = vpop.eup %568  ;;  %v367_v36 = vadd.f32 1.0, %v567_v33 }
  0xfb   : > { %v513_v31 = vpack.c.bf16 %v378_v28, %v378_v28  ;;  %v381_v32 = vmul.f32 %v373_v29, %v317_v19  ;;  %v371_v38 = vadd.f32 1.0, %v569_v34 }
  0xfc   : > { %415 = vst.msk [vmem:[%s679_s27] sm:$0xf] %vm414_vm3, %v509_v20  ;;  %v512_v25 = vpack.c.bf16 %v377_v30, %v377_v30  ;;  %v375_v39 = vmul.f32 %v367_v36, %v311_v26 }
  0xfd   : > { %419 = vst.msk [vmem:[%s679_s27 + $0x10] sm:$0xf] %vm414_vm3, %v513_v31  ;;  %v516_v35 = vpack.c.bf16 %v381_v32, %v381_v32  ;;  %v379_v41 = vmul.f32 %v371_v38, %v315_v37 }
  0xfe   : > { %418 = vst.msk [vmem:[%s679_s27 + $0xc] sm:$0xf] %vm414_vm3, %v512_v25  ;;  %v510_v42 = vpack.c.bf16 %v375_v39, %v375_v39 }
  0xff   : > { %422 = vst.msk [vmem:[%s679_s27 + $0x1c] sm:$0xf] %vm414_vm3, %v516_v35  ;;  %v514_v43 = vpack.c.bf16 %v379_v41, %v379_v41 }
 0x100   : > { %416 = vst.msk [vmem:[%s679_s27 + $0x4] sm:$0xf] %vm414_vm3, %v510_v42 }
 0x101   : > { %420 = vst.msk [vmem:[%s679_s27 + $0x14] sm:$0xf] %vm414_vm3, %v514_v43 }
 0x102 PF: > { %s13_s12 = sadd.s32 1, %s576_s12  }
 0x103   : > { %p10_p4 = scmp.ge.s32.totalorder %s13_s12, 4  }
 0x105   :  { %12 = sbr.rel (!%p10_p4) target bundleno = 1 (0x1), region = 62 }

// kernel: stem_conv_forward.3
= control target key start
LH: loop header
LB: loop body
LE: loop exit
PB: predicated region body
PF: predicated region fallthrough
CT: control target
= control target key end

     0   :  { %8 = vsyncpa [#allocation3], 0  ;;  %s689_s0 = inlined_call_operand.vmem [shape: bf16[32,144], index: 0, kind: input, shape index: {}]   ;;  %s690_s1 = inlined_call_operand.vmem [shape: bf16[144,32], index: 1, kind: input, shape index: {}]   ;;  %s691_s2 = inlined_call_operand.vmem [shape: f32[1,32], index: 2, kind: input, shape index: {}]   ;;  %s692_s3 = inlined_call_operand.hbm [shape: f32[32,32], index: 3, kind: output, shape index: {}]  }
   0x1   :  { %10 = vsyncpa [#allocation3 + $0x1], 0  ;;  %s558_s12 = smov 0   ;;  %s560_s13 = smov 0  }
   0x2   :  { %s562_s14 = smov 0   ;;  %s564_s15 = smov 0  }
   0x3 LB: > { %s579_s16 = sadd.s32 4294967295, %s532_s15   ;;  %s390_s17 = sadd.s32 4294967294, %s532_s15   ;;  %s532_s15 = sphi %s564_s15, %s698_s15   ;;  %s528_s14 = sphi %s562_s14, %s697_s14   ;;  %s524_s13 = sphi %s560_s13, %s696_s13   ;;  %s520_s12 = sphi %s558_s12, %s695_s12  }
   0x4   : > { %s583_s18 = sadd.s32 1, %s532_s15   ;;  %s91_s19 = sadd.s32 1, %s528_s14 }
   0x5   : > { %s88_s20 = ssub.s32 %s532_s15, %s583_s18  ;;  %p101_p0 = scmp.ne.s32.totalorder %s528_s14, %s524_s13 }
   0x6   : > { %p89_p1 = scmp.eq.s32.totalorder %s88_s20, 0  ;;  %p102_p2 = scmp.eq.s32.totalorder %s579_s16, 1 }
   0x7   : > { %p107_p3 = scmp.ne.s32.totalorder %s524_s13, %s520_s12  ;;  %p108_p4 = scmp.eq.s32.totalorder %s390_s17, 1 }
   0x8   : > { %s594_s21 = scalar_select %p89_p1, %s528_s14, %s91_s19  }
   0x9   : > { %p596_p5 = por %p102_p2, %p101_p0  ;;  %p600_p6 = por %p108_p4, %p107_p3 }
   0xa   : > { %p393_p7 = scmp.ge.s32.totalorder %s532_s15, 1  ;;  %p142_p8 = scmp.lt.s32.totalorder %s532_s15, 3 }
   0xc   : > { %p143_p9 = pnand %p393_p7, %p142_p8 }
   0xd   : > { %s395_s26 = sshll.u32 (!%p143_p9), %s579_s16, 1  ;;  %s164_s29 = sand.u32 (!%p143_p9), 1, %s524_s13  }
   0xe   : > { %146 = sbr.rel (%p143_p9) target bundleno = 269 (0x10d), region = 32  ;;  %p168_p10 = scmp.lt.s32.totalorder (!%p143_p9), %s395_s26, 3 }
   0xf   : > { %s394_s30 = sshll.u32 (!%p143_p9), %s164_s29, 4  ;;  %s417_s9 = sshll.u32 (!%p143_p9), %s579_s16, 8 }
  0x10   : > { %s166_s6 = scalar_lea.vmem (!%p143_p9), [#allocation2], %s394_s30  ;;  %s647_s11 = scalar_lea.hbm (!%p143_p9), %s692_s3, %s417_s9 }
  0x11   : > { %s328_s8 = sshll.u32 (!%p143_p9), %s166_s6, 4  ;;  %s649_s17 = scalar_lea.sflag (!%p143_p9), [#allocation3], %s164_s29  ;;  %s642_s8 = int_to_ptr.vmem [resolvable:$true] %s328_s8 }
  0x12   : > { %s472_s19 = scalar_lea.vmem (!%p143_p9), %s642_s8, 256  ;;  %s535_s16 = smov (!%p143_p9), [#allocation2]  }
  0x13   : > { %v460_v0 = vld [vmem:[%s690_s1 + $0x38] sm:$0xff]   ;;  %v534_v1 = vmov 0   ;;  %v461_v2 = vld [vmem:[%s690_s1 + $0x30] sm:$0xff]   ;;  %s700_s26 = smov (!%p168_p10, %s395_s26), 3  ;;  %v462_v3 = vld [vmem:[%s690_s1 + $0x28] sm:$0xff]   ;;  %vm266_vm0 = vcmask 130048   ;;  %p473_p11 = scmp.ne.s32.totalorder %s642_s8, %s472_s19 }
  0x14   : > { %270 = vmatprep.subr.bf16.mxu0 %v534_v1  ;;  %s416_s4 = sshll.u32 %s700_s26, 3  ;;  %v463_v4 = vld [vmem:[%s690_s1 + $0x20] sm:$0xff]   ;;  %v464_v6 = vld [vmem:[%s690_s1 + $0x18] sm:$0xff]   ;;  %v465_v7 = vld [vmem:[%s690_s1 + $0x10] sm:$0xff]   ;;  %vm311_vm1 = vcmask 261120   ;;  %s476_s20 = sshll.u32 %s535_s16, 4  ;;  %s477_s20 = int_to_ptr.vmem [resolvable:$false] %s476_s20 }
  0x15   : > { %271 = vmatpush1.bf16.msra.mxu0 %v460_v0  ;;  %s172_s7 = scalar_lea.vmem %s689_s0, %s416_s4  ;;  %v466_v8 = vld [vmem:[%s690_s1 + $0x8] sm:$0xff]   ;;  %v467_v9 = vld [vmem:[%s690_s1] sm:$0xff]   ;;  %p474_p12 = pnand %p473_p11, %p596_p5 }
  0x16   : > { %272 = vmatprep.subr.bf16.mxu0 %v534_v1  ;;  %v471_v5 = vld [vmem:[%s172_s7 + $0x4] ss:$8 sps:$4 sm:$0xff]   ;;  %v469_v11 = vld [vmem:[%s172_s7] ss:$8 sps:$4 sm:$0xff]   ;;  %s478_s24 = scalar_lea.vmem %s477_s20, 512  ;;  %p479_p0 = scmp.lt.s32.totalorder %s642_s8, %s477_s20 }
  0x17   : > { %410 = vmatprep.mubr.msk.bf16.mxu0 %vm266_vm0, %v471_v5  ;;  %v468_v10 = vld [vmem:[%s690_s1 + $0x40] sm:$0xff]   ;;  %p475_p13 = pneg %p474_p12  ;;  %p480_p1 = scmp.lt.s32.totalorder %s478_s24, %s472_s19 }
  0x18   : > { %v398_v12 = vld [vmem:[%s691_s2] ss:$0 sm:$0xff] }
  0x19   : > { %273 = vmatpush1.bf16.msra.mxu0 %v461_v2  ;;  %p481_p2 = por %p480_p1, %p479_p0 }
  0x1a   : > { %274 = vmatprep.subr.bf16.mxu0 %v534_v1 }
  0x1b   : > { %p482_p3 = pnand %p481_p2, %p475_p13 }
  0x1d   : > { %275 = vmatpush1.bf16.msra.mxu0 %v462_v3 }
  0x1e   : > { %276 = vmatprep.subr.bf16.mxu0 %v534_v1 }
  0x21   : > { %277 = vmatpush1.bf16.msra.mxu0 %v463_v4 }
  0x22   : > { %278 = vmatprep.subr.bf16.mxu0 %v534_v1 }
  0x25   : > { %279 = vmatpush1.bf16.msra.mxu0 %v464_v6 }
  0x26   : > { %280 = vmatprep.subr.bf16.mxu0 %v534_v1 }
  0x29   : > { %281 = vmatpush1.bf16.msra.mxu0 %v465_v7 }
  0x2a   : > { %282 = vmatprep.subr.bf16.mxu0 %v534_v1 }
  0x2d   : > { %283 = vmatpush1.bf16.msra.mxu0 %v466_v8 }
  0x2e   : > { %284 = vmatprep.subr.bf16.mxu0 %v534_v1 }
  0x31   : > { %285 = vmatpush1.bf16.msra.mxu0 %v467_v9 }
  0x32   : > { %300 = vmatprep.subr.bf16.mxu0 %v534_v1 }
  0x35   : > { %301 = vmatpush2.bf16.msra.mxu0 %v468_v10 }
  0x38   : > { %303 = vmatmul.mubr.bf16.vlgmr.msra.gmra.mxu0 %v469_v11 }
  0xf8   : > { %v304_v13 = vpop.f32.mrf.mxu0 }
  0xf9   : > { %v305_v14 = vadd.f32 %v398_v12, %v304_v13 }
  0xfa   : > { %v306_v15 = vpop.f32.mrf.mxu0 }
  0xfb   : > { %312 = vst.msk [vmem:[%s166_s6] sm:$0xff] %vm311_vm1, %v305_v14 }
  0xfc   : > { %v307_v16 = vpop.f32.mrf.mxu0 }
  0xfd   : > { %v308_v17 = vadd.f32 %v398_v12, %v307_v16 }
  0xfe   : > { %v309_v18 = vpop.f32.mrf.mxu0 }
  0xff   : > { %313 = vst.msk [vmem:[%s166_s6 + $0x8] sm:$0xff] %vm311_vm1, %v308_v17 }
 0x100   : > { %485 = shalt.err (!%p482_p3)
}
 0x101   : > { %s486_s25 = scalar_lea.hbm %s647_s11, 256  ;;  %s490_s28 = scalar_lea.hbm %s692_s3, 512 }
 0x102   : > { %p487_p4 = scmp.ne.s32.totalorder %s647_s11, %s486_s25  ;;  %p491_p9 = scmp.lt.s32.totalorder %s647_s11, %s692_s3 }
 0x103   : > { %p492_p10 = scmp.lt.s32.totalorder %s490_s28, %s486_s25 }
 0x104   : > { %p488_p7 = pnand %p487_p4, %p596_p5 }
 0x105   : > { %p493_p11 = por %p492_p10, %p491_p9 }
 0x106   : > { %p489_p8 = pneg %p488_p7 }
 0x108   : > { %p494_p12 = pnand %p493_p11, %p489_p8 }
 0x10a   : > { %497 = shalt.err (!%p494_p12)
}
 0x10b   : > { %s536_s4 = smov 128   ;;  %s537_s5 = smov 8  }
 0x10c   : > { %418 = dma.vmem_to_hbm [thread:$0]  (%p596_p5), %s642_s8, 256, %s647_s11, %s649_s17, %s536_s4, %s536_s4, %s537_s5  }
 0x10d PF: > { %p424_p13 = scmp.ge.s32.totalorder %s532_s15, 2  ;;  %s343_s6 = sand.u32 1, %s520_s12  }
 0x10e   : > { %s344_s9 = scalar_lea.sflag [#allocation3], %s343_s6 }
 0x10f   : > { %p421_p0 = pnand %p424_p13, %p600_p6 }
 0x111   : > { %p422_p1 = pneg %p421_p0 }
 0x113   : > { %515 = dma.done.wait (%p422_p1), %s344_s9, 256  }
 0x114   : > { %517 = vsyncadd (%p422_p1), %s344_s9, 4294967040  ;;  %p13_p2 = scmp.ge.s32.totalorder %s583_s18, 4   ;;  %s695_s12 = smov %s524_s13 }
 0x115   : > { %s696_s13 = smov %s528_s14  ;;  %s697_s14 = smov %s594_s21 }
 0x116   : > { %s698_s15 = smov %s583_s18  ;;  %15 = sbr.rel (!%p13_p2) target bundleno = 3 (0x3), region = 67 }
 0x11b   :  { %349 = vsyncpa [#allocation3], 1 }
 0x11c   :  { %351 = vsyncpa [#allocation3 + $0x1], 1 }

</bundles_post_ra>
